<compile_context>
chip_gen: v7x
topology: tpu7x:2x2x1
jax: 0.10.0
libtpu: 0.0.40
codegen_flags: <defaults>
</compile_context>

<pallas_src>
import jax
import jax.numpy as jnp
from jax import lax
from jax.experimental import pallas as pl
from jax.experimental.pallas import tpu as pltpu


# ---------------------------------------------------------------------------
# Kernel A: conv as ONE K=KH*KW*Cin contraction per M-tile + BN partial stats.
#   w_ref : [Cout, K]        (compute dtype)  -- constant block, resident
#   x_ref : [K, TM]          (compute dtype)  -- lane-dense im2col tile
#   y_ref : [Cout, TM]       (f32)            -- raw conv output tile
#   s_ref : [1, Cout, 2]     (f32)            -- per-tile [sum, sum_of_squares]
# ---------------------------------------------------------------------------
def conv_stats_kernel(w_ref, x_ref, y_ref, s_ref):
    y = jnp.dot(w_ref[...], x_ref[...], preferred_element_type=jnp.float32)
    y_ref[...] = y
    s = jnp.sum(y, axis=1, keepdims=True)        # [Cout, 1]
    sq = jnp.sum(y * y, axis=1, keepdims=True)   # [Cout, 1]
    s_ref[0] = jnp.concatenate([s, sq], axis=1)  # [Cout, 2]


# ---------------------------------------------------------------------------
# Kernel B: finalize BatchNorm (precomputed per-channel scale/shift) + ReLU.
#   y_ref     : [Cout, TM] (f32)
#   scale_ref : [Cout, 1]  (f32)   scale = gamma * rsqrt(var + eps)
#   shift_ref : [Cout, 1]  (f32)   shift = beta  - mean * scale
# ---------------------------------------------------------------------------
def bn_relu_kernel(y_ref, scale_ref, shift_ref, o_ref):
    o_ref[...] = jnp.maximum(
        y_ref[...] * scale_ref[...] + shift_ref[...], 0.0)


def _pick_tile_m(m):
    """Largest aligned M tile that still gives >=2 programs (v7x has 2 TCs).

    For big problems this cap should instead be derived from the per-generation
    VMEM budget (v7x: 64 MiB physical vs 128 MiB on v5e/v6e, double-buffered).
    """
    for t in (1024, 512, 256, 128):
        if m % t == 0 and m // t >= 2:
            return t
    return m  # single full block fallback (full dim is always a legal block)


def conv_bn_relu_forward(x_nchw, w_oihw, gamma, beta, *, stride=1, eps=1e-5,
                         compute_dtype=jnp.bfloat16):
    """Forward pass matching the PyTorch module (training-mode BN)."""
    n, cin, h, w = x_nchw.shape
    cout, _, kh, kw = w_oihw.shape
    pad = (kh - 1) // 2
    ho = (h + 2 * pad - kh) // stride + 1
    wo = (w + 2 * pad - kw) // stride + 1
    m = n * ho * wo
    k = kh * kw * cin
    tm = _pick_tile_m(m)
    num_m = m // tm

    # ---- glue: layout conversion / im2col (pure data movement, runs in XLA) ---
    # Build X^T = [K, M] so the large dim M is the lane axis (lane-dense loads,
    # lane-dense matmul output, lane-dense stores).
    xt = jnp.transpose(x_nchw.astype(jnp.float32), (1, 0, 2, 3))       # [Cin,N,H,W]
    xt_p = jnp.pad(xt, ((0, 0), (0, 0), (pad, pad), (pad, pad)))
    taps = []
    for ih in range(kh):
        for iw in range(kw):
            sl = xt_p[:, :,
                      ih:ih + (ho - 1) * stride + 1:stride,
                      iw:iw + (wo - 1) * stride + 1:stride]            # [Cin,N,Ho,Wo]
            taps.append(sl.reshape(cin, m))
    x2dT = jnp.concatenate(taps, axis=0).astype(compute_dtype)          # [K, M]
    # Conv weight OIHW -> [Cout, K] with column ordering (tap-major, Cin-minor)
    # matching the x2dT rows.
    w2dT = jnp.transpose(w_oihw, (0, 2, 3, 1)).reshape(cout, k)
    w2dT = w2dT.astype(compute_dtype)                                   # [Cout, K]

    # ---- Pallas pass 1: conv (single K-deep MXU contraction) + BN partial sums
    itemsize = jnp.dtype(compute_dtype).itemsize
    bytes_a = (x2dT.size * itemsize + w2dT.size * itemsize
               + m * cout * 4 + num_m * cout * 2 * 4)
    y_flat, part = pl.pallas_call(
        conv_stats_kernel,
        out_shape=(jax.ShapeDtypeStruct((cout, m), jnp.float32),
                   jax.ShapeDtypeStruct((num_m, cout, 2), jnp.float32)),
        grid=(num_m,),
        in_specs=[pl.BlockSpec((cout, k), lambda i: (0, 0)),
                  pl.BlockSpec((k, tm), lambda i: (0, i))],
        out_specs=(pl.BlockSpec((cout, tm), lambda i: (0, i)),
                   pl.BlockSpec((1, cout, 2), lambda i: (i, 0, 0))),
        compiler_params=pltpu.CompilerParams(
            dimension_semantics=("parallel",)),
        cost_estimate=pl.CostEstimate(flops=2 * m * k * cout,
                                      transcendentals=0,
                                      bytes_accessed=bytes_a),
    )(w2dT, x2dT)

    # ---- cross-tile combine of BN stats: O(num_m * Cout) scalars (f32) -------
    sums = jnp.sum(part[:, :, 0], axis=0)                 # [Cout]
    sqs = jnp.sum(part[:, :, 1], axis=0)                  # [Cout]
    mean = sums / m
    var = jnp.maximum(sqs / m - mean * mean, 0.0)         # biased (training BN)
    inv = lax.rsqrt(var + eps)
    g32 = gamma.astype(jnp.float32)
    b32 = beta.astype(jnp.float32)
    scale = (g32 * inv).reshape(cout, 1)
    shift = (b32 - mean * g32 * inv).reshape(cout, 1)

    # ---- Pallas pass 2: normalize (affine) + ReLU, lane-dense tiles ----------
    bytes_b = 2 * m * cout * 4 + 2 * cout * 4
    out_flat = pl.pallas_call(
        bn_relu_kernel,
        out_shape=jax.ShapeDtypeStruct((cout, m), jnp.float32),
        grid=(num_m,),
        in_specs=[pl.BlockSpec((cout, tm), lambda i: (0, i)),
                  pl.BlockSpec((cout, 1), lambda i: (0, 0)),
                  pl.BlockSpec((cout, 1), lambda i: (0, 0))],
        out_specs=pl.BlockSpec((cout, tm), lambda i: (0, i)),
        compiler_params=pltpu.CompilerParams(
            dimension_semantics=("parallel",)),
        cost_estimate=pl.CostEstimate(flops=2 * m * cout,
                                      transcendentals=0,
                                      bytes_accessed=bytes_b),
    )(y_flat, scale, shift)

    # back to NCHW (PyTorch convention)
    return jnp.transpose(out_flat.reshape(cout, n, ho, wo), (1, 0, 2, 3))


def reference_forward(x_nchw, w_oihw, gamma, beta, *, stride=1, eps=1e-5,
                      compute_dtype=jnp.bfloat16):
    """Pure-JAX reference with identical semantics (same matmul input dtype,
    f32 accumulation) for the correctness check."""
    kh = w_oihw.shape[2]
    pad = (kh - 1) // 2
    y = lax.conv_general_dilated(
        x_nchw.astype(compute_dtype), w_oihw.astype(compute_dtype),
        window_strides=(stride, stride),
        padding=[(pad, pad), (pad, pad)],
        dimension_numbers=("NCHW", "OIHW", "NCHW"),
        preferred_element_type=jnp.float32)
    mean = jnp.mean(y, axis=(0, 2, 3), keepdims=True)
    var = jnp.mean(jnp.square(y - mean), axis=(0, 2, 3), keepdims=True)
    yn = (y - mean) * lax.rsqrt(var + eps) * gamma.reshape(1, -1, 1, 1) \
        + beta.reshape(1, -1, 1, 1)
    return jnp.maximum(yn, 0.0)


if __name__ == "__main__":
    # Module config: conv_bn_relu(kernel=3, numIn=4, numOut=8, stride=1)
    N, CIN, H, W = 2, 4, 16, 16
    COUT, K, STRIDE = 8, 3, 1

    key = jax.random.PRNGKey(0)
    kx, kw_, kg, kb = jax.random.split(key, 4)

    x = jax.random.normal(kx, (N, CIN, H, W), dtype=jnp.float32)
    # Conv2d weight [Cout, Cin, KH, KW], bias=False; deterministic synthetic init.
    w = jax.random.normal(kw_, (COUT, CIN, K, K), dtype=jnp.float32) \
        * (1.0 / (CIN * K * K) ** 0.5)
    # BatchNorm affine params (perturbed from PyTorch defaults 1/0 so they matter).
    gamma = 1.0 + 0.1 * jax.random.normal(kg, (COUT,), dtype=jnp.float32)
    beta = 0.1 * jax.random.normal(kb, (COUT,), dtype=jnp.float32)

    out = conv_bn_relu_forward(x, w, gamma, beta, stride=STRIDE)
    out = jax.block_until_ready(out)

    ref = reference_forward(x, w, gamma, beta, stride=STRIDE)
    assert out.shape == (N, COUT, H, W), out.shape
    max_err = float(jnp.max(jnp.abs(out - ref)))
    assert jnp.allclose(out, ref, atol=2e-3, rtol=2e-3), max_err

    print("KERNEL_OK")
</pallas_src>

<mosaic_0001>
module attributes {stable_mosaic.version = 11 : i64} {
  func.func @conv_stats_kernel(%arg0: i32, %arg1: memref<8x36xbf16, #tpu.memory_space<vmem>>, %arg2: memref<36x256xbf16, #tpu.memory_space<vmem>>, %arg3: memref<8x256xf32, #tpu.memory_space<vmem>>, %arg4: memref<1x8x2xf32, #tpu.memory_space<vmem>>) attributes {dimension_semantics = [#tpu.dimension_semantics<parallel>], iteration_bounds = array<i64: 2>, scalar_prefetch = 0 : i64, scratch_operands = 0 : i64, tpu.core_type = #tpu.core_type<tc>, window_params = [{pipeline_mode = #tpu.pipeline_mode<synchronous>, transform_indices = @transform_0, window_bounds = array<i64: 8, 36>}, {transform_indices = @transform_1, window_bounds = array<i64: 36, 256>}, {transform_indices = @transform_2, window_bounds = array<i64: 8, 256>}, {transform_indices = @transform_3, window_bounds = array<i64: 1, 8, 2>}]} {
    %c0 = arith.constant 0 : index
    %c0_0 = arith.constant 0 : index
    %0 = vector.load %arg1[%c0, %c0_0] : memref<8x36xbf16, #tpu.memory_space<vmem>>, vector<8x36xbf16>
    %c0_1 = arith.constant 0 : index
    %c0_2 = arith.constant 0 : index
    %1 = vector.load %arg2[%c0_1, %c0_2] : memref<36x256xbf16, #tpu.memory_space<vmem>>, vector<36x256xbf16>
    %cst = arith.constant dense<0.000000e+00> : vector<8x256xf32>
    %2 = tpu.matmul %0, %1, %cst {dimension_numbers = #tpu.dot_dimension_numbers<[1], [0], [0], [1], [0, 0, 1, 1], [], []>} : vector<8x36xbf16>, vector<36x256xbf16>, vector<8x256xf32> -> vector<8x256xf32>
    %c0_3 = arith.constant 0 : index
    %c0_4 = arith.constant 0 : index
    %3 = vector.load %arg3[%c0_3, %c0_4] : memref<8x256xf32, #tpu.memory_space<vmem>>, vector<8x256xf32>
    tpu.vector_store %arg3[%c0_3, %c0_4], %2 {strides = array<i32>} : memref<8x256xf32, #tpu.memory_space<vmem>>, vector<8x256xf32>,
    %cst_5 = arith.constant dense<0.000000e+00> : vector<8xf32>
    %4 = vector.multi_reduction <add>, %2, %cst_5 [1] : vector<8x256xf32> to vector<8xf32>
    %5 = vector.shape_cast %4 : vector<8xf32> to vector<8x1xf32>
    %6 = arith.mulf %2, %2 : vector<8x256xf32>
    %cst_6 = arith.constant dense<0.000000e+00> : vector<8xf32>
    %7 = vector.multi_reduction <add>, %6, %cst_6 [1] : vector<8x256xf32> to vector<8xf32>
    %8 = vector.shape_cast %7 : vector<8xf32> to vector<8x1xf32>
    %9 = tpu.concatenate %5, %8 in 1 : vector<8x1xf32>, vector<8x1xf32> -> vector<8x2xf32>
    %c0_7 = arith.constant 0 : index
    %c0_8 = arith.constant 0 : index
    %c0_9 = arith.constant 0 : index
    %10 = vector.load %arg4[%c0_7, %c0_8, %c0_9] : memref<1x8x2xf32, #tpu.memory_space<vmem>>, vector<1x8x2xf32>
    %11 = vector.shape_cast %10 : vector<1x8x2xf32> to vector<8x2xf32>
    %12 = vector.shape_cast %9 : vector<8x2xf32> to vector<1x8x2xf32>
    tpu.vector_store %arg4[%c0_7, %c0_8, %c0_9], %12 {strides = array<i32>} : memref<1x8x2xf32, #tpu.memory_space<vmem>>, vector<1x8x2xf32>,
    return
  }
  func.func @transform_0(%arg0: i32) -> (i32, i32) {
    %c0_i32 = arith.constant 0 : i32
    %c0_i32_0 = arith.constant 0 : i32
    %c0_i32_1 = arith.constant 0 : i32
    return %c0_i32, %c0_i32_0 : i32, i32
  }
  func.func @transform_1(%arg0: i32) -> (i32, i32) {
    %c0_i32 = arith.constant 0 : i32
    %c0_i32_0 = arith.constant 0 : i32
    return %c0_i32, %arg0 : i32, i32
  }
  func.func @transform_2(%arg0: i32) -> (i32, i32) {
    %c0_i32 = arith.constant 0 : i32
    %c0_i32_0 = arith.constant 0 : i32
    return %c0_i32, %arg0 : i32, i32
  }
  func.func @transform_3(%arg0: i32) -> (i32, i32, i32) {
    %c0_i32 = arith.constant 0 : i32
    %c0_i32_0 = arith.constant 0 : i32
    %c0_i32_1 = arith.constant 0 : i32
    return %arg0, %c0_i32, %c0_i32_0 : i32, i32, i32
  }
}

</mosaic_0001>

<bundles_post_ra>
// kernel: tpu_custom_call.1
= control target key start
LH: loop header
LB: loop body
LE: loop exit
PB: predicated region body
PF: predicated region fallthrough
CT: control target
= control target key end

     0   :  { %9 = vsyncpa [#allocation3], 0  ;;  %s889_s0 = inlined_call_operand.hbm [shape: bf16[8,36], index: 0, kind: input, shape index: {}]   ;;  %s890_s1 = inlined_call_operand.hbm [shape: bf16[36,512], index: 1, kind: input, shape index: {}]   ;;  %s891_s2 = inlined_call_operand.hbm [shape: f32[8,512], index: 2, kind: output, shape index: {0}]   ;;  %s892_s3 = inlined_call_operand.vmem [shape: f32[2,8,2], index: 3, kind: output, shape index: {1}]  }
   0x1   :  { %10 = vsyncpa [#allocation6], 0 }
   0x2   :  { %12 = vsyncpa [#allocation6 + $0x1], 0 }
   0x3   :  { %13 = vsyncpa [#allocation4], 0 }
   0x4   :  { %15 = vsyncpa [#allocation4 + $0x1], 0  ;;  %s694_s12 = smov 0   ;;  %s696_s13 = smov 0  }
   0x5   :  { %s698_s14 = smov 0   ;;  %s700_s15 = smov 0  }
   0x6 LB: > { %s715_s16 = sadd.s32 4294967295, %s665_s15   ;;  %s441_s17 = sadd.s32 4294967294, %s665_s15   ;;  %s665_s15 = sphi %s700_s15, %s917_s15   ;;  %s661_s14 = sphi %s698_s14, %s916_s14   ;;  %s657_s13 = sphi %s696_s13, %s915_s13   ;;  %s653_s12 = sphi %s694_s12, %s914_s12  }
   0x7   : > { %s719_s18 = sadd.s32 1, %s665_s15   ;;  %s49_s19 = sadd.s32 1, %s661_s14 }
   0x8   : > { %s46_s20 = ssub.s32 %s665_s15, %s719_s18  ;;  %p56_p0 = scmp.ne.s32.totalorder %s661_s14, %s657_s13 }
   0x9   : > { %p47_p1 = scmp.eq.s32.totalorder %s46_s20, 0  ;;  %p57_p2 = scmp.eq.s32.totalorder %s665_s15, 0 }
   0xa   : > { %p62_p3 = scmp.ne.s32.totalorder %s657_s13, %s653_s12  ;;  %p893_p4 = scmp.eq.s32.totalorder %s715_s16, 0 }
   0xb   : > { %s731_s21 = scalar_select %p47_p1, %s661_s14, %s49_s19  }
   0xc   : > { %p733_p5 = por %p57_p2, %p56_p0  ;;  %p739_p6 = por %p893_p4, %p62_p3 }
   0xd   : > { %p86_p7 = scmp.eq.s32.totalorder %s715_s16, 1  ;;  %p92_p8 = scmp.eq.s32.totalorder %s441_s17, 1 }
   0xe   : > { %s899_s23 = scalar_select %p739_p6, 1, 0 }
   0xf   : > { %p442_p9 = scmp.ge.s32.totalorder %s665_s15, 1  ;;  %p125_p10 = scmp.lt.s32.totalorder %s665_s15, 3 }
  0x10   : > { %p746_p11 = por %p86_p7, %p56_p0  ;;  %p750_p12 = por %p92_p8, %p62_p3 }
  0x11   : > { %p754_p13 = pnand %p442_p9, %p125_p10  ;;  %s667_s27 = smov [#allocation2]  }
  0x12   : > { %s900_s24 = scalar_select %p746_p11, 1, 0 }
  0x13   : > { %s901_s25 = scalar_select %p750_p12, 1, 0 }
  0x14   : > { %s902_s26 = scalar_select %p754_p13, 1, 0 }
  0x15   : > { %p476_p2 = pneg %p754_p13  ;;  %s138_s28 = sshll.u32 %s667_s27, 4  ;;  %s139_s28 = int_to_ptr.vmem [resolvable:$true] %s138_s28 }
  0x16   : > { %p489_p4 = scmp.lt.s32.totalorder %s665_s15, 2  ;;  %p903_p0 = scmp.eq.s32.totalorder %s715_s16, 0 }
  0x17   : > { %s149_s30 = sand.u32 1, %s661_s14   ;;  %s537_s8 = scalar_lea.hbm %s889_s0, 64 }
  0x18   : > { %p764_p7 = pnand %p476_p2, %p903_p0  ;;  %p771_p3 = pnand %p489_p4, %p733_p5 }
  0x19   : > { %s466_s5 = smul.u32 40, %s149_s30  ;;  %p538_p8 = scmp.ne.s32.totalorder %s889_s0, %s537_s8 }
  0x1a   : > { %s905_s4 = scalar_select %p771_p3, 1, 0 }
  0x1b   : > { %p539_p9 = pneg %p764_p7  ;;  %p544_p4 = scmp.lt.u32.totalorder %s537_s8, %s889_s0 }
  0x1d   : > { %p540_p10 = pnand %p539_p9, %p538_p8 }
  0x1f   : > { %p541_p2 = pneg %p540_p10 }
  0x21   : > { %p546_p5 = pnand %p544_p4, %p541_p2 }
  0x23   : > { %549 = shalt.err (!%p546_p5)
}
  0x24   : > { %s550_s19 = scalar_lea.vmem %s139_s28, 64  ;;  %p558_p11 = scmp.lt.s32.totalorder %s139_s28, %s139_s28 }
  0x25   : > { %p551_p0 = scmp.ne.s32.totalorder %s139_s28, %s550_s19  ;;  %p559_p6 = scmp.lt.s32.totalorder %s550_s19, %s550_s19 }
  0x27   : > { %p553_p1 = pnand %p551_p0, %p539_p9  ;;  %p560_p13 = por %p559_p6, %p558_p11 }
  0x29   : > { %p554_p12 = pneg %p553_p1 }
  0x2b   : > { %p561_p3 = pnand %p560_p13, %p554_p12 }
  0x2d   : > { %564 = shalt.err (!%p561_p3)
}
  0x2e   : > { %479 = dma.hbm_to_vmem [thread:$0]  (!%p764_p7), %s889_s0, 64, %s139_s28, [#allocation3]  }
  0x2f   : > { %s464_s27 = sshll.u32 %s665_s15, 7  ;;  %s153_s6 = scalar_lea.vmem [#allocation5], %s466_s5 }
  0x30   : > { %s160_s7 = sshll.u32 %s153_s6, 4  ;;  %s795_s10 = scalar_lea.hbm %s890_s1, %s464_s27  ;;  %s797_s7 = int_to_ptr.vmem [resolvable:$true] %s160_s7 }
  0x31   : > { %s799_s29 = scalar_lea.sflag [#allocation6], %s149_s30  ;;  %s565_s11 = scalar_lea.hbm %s795_s10, 640 }
  0x32   : > { %p566_p6 = scmp.ne.s32.totalorder %s795_s10, %s565_s11  ;;  %p906_p11 = scmp.ne.s32.totalorder %s905_s4, 0 }
  0x33   : > { %s570_s17 = scalar_lea.hbm %s890_s1, 1280  ;;  %p571_p7 = scmp.lt.u32.totalorder %s795_s10, %s890_s1 }
  0x34   : > { %p567_p12 = pneg %p906_p11  ;;  %p572_p3 = scmp.lt.u32.totalorder %s570_s17, %s565_s11 }
  0x35   : > { %p574_p9 = scmp.lt.u32.totalorder %s565_s11, %s795_s10 }
  0x36   : > { %p568_p13 = pnand %p567_p12, %p566_p6  ;;  %p573_p8 = por %p572_p3, %p571_p7 }
  0x38   : > { %p569_p1 = pneg %p568_p13  ;;  %p575_p10 = por %p574_p9, %p573_p8 }
  0x3a   : > { %p576_p2 = pnand %p575_p10, %p569_p1 }
  0x3c   : > { %579 = shalt.err (!%p576_p2)
}
  0x3d   : > { %s580_s30 = scalar_lea.vmem %s797_s7, 640  ;;  %s668_s22 = smov [#allocation5]  }
  0x3e   : > { %p581_p4 = scmp.ne.s32.totalorder %s797_s7, %s580_s30  ;;  %s585_s27 = sshll.u32 %s668_s22, 4  ;;  %s586_s27 = int_to_ptr.vmem [resolvable:$false] %s585_s27 }
  0x3f   : > { %s587_s6 = scalar_lea.vmem %s586_s27, 1280  ;;  %p588_p6 = scmp.lt.s32.totalorder %s797_s7, %s586_s27 }
  0x40   : > { %p583_p5 = pnand %p581_p4, %p567_p12  ;;  %p589_p13 = scmp.lt.s32.totalorder %s587_s6, %s580_s30 }
  0x42   : > { %p584_p0 = pneg %p583_p5  ;;  %p590_p7 = por %p589_p13, %p588_p6 }
  0x44   : > { %p591_p3 = pnand %p590_p7, %p584_p0 }
  0x46   : > { %594 = shalt.err (!%p591_p3)
}
  0x47   : > { %s669_s8 = smov 256   ;;  %s670_s9 = smov 128  }
  0x48   : > { %s671_s11 = smov 8   ;;  %p907_p12 = scmp.ne.s32.totalorder %s902_s26, 0 }
  0x49   : > { %483 = dma.hbm_to_vmem [thread:$0]  (!%p906_p11), %s795_s10, 640, %s797_s7, %s799_s29, %s669_s8, %s670_s9, %s671_s11  }
  0x4a   : > { %172 = sbr.rel (%p907_p12) target bundleno = 463 (0x1cf), region = 28  ;;  %p908_p1 = scmp.eq.s32.totalorder (!%p907_p12), %s715_s16, 0 }
  0x51   : > { %640 = dma.done.wait (%p908_p1), [#allocation3], 64   ;;  %p909_p8 = pmov %p908_p1 }
  0x52   : > { %s834_s28 = sand.u32 1, %s657_s13   ;;  %p910_p9 = scmp.ne.s32.totalorder %s899_s23, 0 }
  0x53   : > { %642 = vsyncadd (%p909_p8), [#allocation3], 4294967232  ;;  %s467_s5 = smul.u32 40, %s834_s28  ;;  %s179_s17 = scalar_lea.sflag [#allocation6], %s834_s28 }
  0x55   : > { %s182_s19 = scalar_lea.vmem [#allocation5], %s467_s5 }
  0x56   : > { %644 = dma.done.wait (%p910_p9), %s179_s17, 640  }
  0x57   : > { %646 = vsyncadd (%p910_p9), %s179_s17, 4294966656  ;;  %v672_v0 = vmov 0   ;;  %v529_v1 = vld [vmem:[%s182_s19 + $0x4] ss:$8 sps:$4 sm:$0xff]   ;;  %v531_v2 = vld [vmem:[%s182_s19] ss:$8 sps:$4 sm:$0xff]  }
  0x58   : > { %290 = vmatprep.mubr.bf16.mxu0 %v672_v0  ;;  %258 = vmatprep.subr.bf16.mxu0 %v529_v1  ;;  %v532_v3 = vld [vmem:[%s182_s19 + $0x14] ss:$8 sps:$4 sm:$0xff]   ;;  %v221_v4 = vld [vmem:[%s182_s19 + $0x20] sm:$0x33]  ;;  %v534_v5 = vld [vmem:[%s182_s19 + $0x10] ss:$8 sps:$4 sm:$0xff]  }
  0x59   : > { %259 = vmatpush1.bf16.msra.mxu0 %v531_v2  ;;  %v456_v6 = vcombine.high %v221_v4, %v221_v4  ;;  %v455_v7 = vcombine.low %v221_v4, %v221_v4  ;;  %vm251_vm0 = vcmask 1041408   ;;  %v216_v9 = vld [vmem:[#allocation2] sm:$0xf]  ;;  %vm247_vm1 = vcmask 293888   ;;  %s449_s23 = sshll.u32 %s834_s28, 4  ;;  %s465_s7 = sshll.u32 %s715_s16, 8 }
  0x5a   : > { %260 = vmatprep.subr.bf16.mxu0 %v532_v3  ;;  %s202_s26 = scalar_lea.vmem [#allocation7], %s449_s23  ;;  %s330_s20 = scalar_lea.hbm %s891_s2, %s465_s7 }
  0x5b   : > { %v253_v8 = vsel %vm251_vm0, %v455_v7, 0  ;;  %s332_s4 = sshll.u32 %s202_s26, 4  ;;  %s314_s30 = scalar_lea.sflag [#allocation4], %s834_s28  ;;  %s843_s4 = int_to_ptr.vmem [resolvable:$true] %s332_s4 }
  0x5c   : > { %s595_s22 = scalar_lea.vmem %s843_s4, 256  ;;  %p911_p10 = scmp.ne.s32.totalorder %s900_s24, 0 }
  0x5d   : > { %261 = vmatpush1.bf16.msra.mxu0 %v534_v5  ;;  %p596_p11 = scmp.ne.s32.totalorder %s843_s4, %s595_s22  ;;  %s673_s27 = smov [#allocation7]  }
  0x5e   : > { %457 = vmatprep.subr.msk.bf16.mxu0 %vm251_vm0, %v456_v6  ;;  %s599_s6 = sshll.u32 %s673_s27, 4  ;;  %s600_s6 = int_to_ptr.vmem [resolvable:$false] %s599_s6 }
  0x5f   : > { %p597_p2 = pnand %p596_p11, %p911_p10  ;;  %s601_s8 = scalar_lea.vmem %s600_s6, 512 }
  0x60   : > { %p602_p5 = scmp.lt.s32.totalorder %s843_s4, %s600_s6  ;;  %p603_p0 = scmp.lt.s32.totalorder %s601_s8, %s595_s22 }
  0x61   : > { %263 = vmatpush1.bf16.msra.mxu0 %v253_v8  ;;  %p598_p4 = pneg %p597_p2 }
  0x62   : > { %p604_p6 = por %p603_p0, %p602_p5 }
  0x64   : > { %458 = vmatmul.mubr.msk.bf16.vlgmr.msra.gmra.mrb[0].mxu0 %vm247_vm1, %v216_v9  ;;  %p605_p13 = pnand %p604_p6, %p598_p4 }
 0x137   : > { %v292_v10 = vpop.f32.mrb[0].mxu0 }
 0x138   : > { %299 = vst [vmem:[%s202_s26] sm:$0xff] %v292_v10  ;;  %v294_v11 = vpop.f32.mrb[1].mxu0  ;;  %v304_v12 = vmul.f32 %v292_v10, %v292_v10 }
 0x139   : > { %300 = vst [vmem:[%s202_s26 + $0x8] sm:$0xff] %v294_v11  ;;  %v296_v13 = vpop.f32.mrb[2].mxu0  ;;  %v301_v14 = vadd.f32 %v294_v11, %v292_v10  ;;  %v305_v15 = vmul.f32 %v294_v11, %v294_v11 }
 0x13a   : > { %v297_v16 = vpop.f32.mrb[3].mxu0 }
 0x13b   : > { %302 = vadd.xlane.f32.xlu0 %v301_v14  ;;  %v306_v17 = vadd.f32 %v305_v15, %v304_v12 }
 0x13f   : > { %307 = vadd.xlane.f32.xlu0 %v306_v17 }
 0x140   : > { %608 = shalt.err (!%p605_p13)
}
 0x141   : > { %s609_s9 = scalar_lea.hbm %s330_s20, 256  ;;  %s613_s5 = scalar_lea.hbm %s891_s2, 512 }
 0x142   : > { %p610_p7 = scmp.ne.s32.totalorder %s330_s20, %s609_s9  ;;  %p614_p1 = scmp.lt.u32.totalorder %s330_s20, %s891_s2 }
 0x143   : > { %p615_p8 = scmp.lt.u32.totalorder %s613_s5, %s609_s9  ;;  %p617_p11 = scmp.lt.u32.totalorder %s609_s9, %s330_s20 }
 0x144   : > { %p611_p3 = pnand %p610_p7, %p911_p10 }
 0x145   : > { %p616_p9 = por %p615_p8, %p614_p1 }
 0x146   : > { %p612_p12 = pneg %p611_p3 }
 0x147   : > { %p618_p2 = por %p617_p11, %p616_p9 }
 0x149   : > { %p619_p4 = pnand %p618_p2, %p612_p12 }
 0x14b   : > { %622 = shalt.err (!%p619_p4)
}
 0x14c   : > { %474 = dma.vmem_to_hbm [thread:$0]  (%p911_p10), %s843_s4, 256, %s330_s20, %s314_s30   ;;  %vm309_vm2 = vcmask 7168   ;;  %vm311_vm3 = vcmask 15360  }
 0x14d   : > { %p211_p5 = scmp.lt.s32.totalorder %s715_s16, 1 }
 0x14f   : > { %s919_s16 = smov (!%p211_p5, %s715_s16), 1 }
 0x150   : > { %s450_s23 = sshll.u32 %s919_s16, 3 }
 0x151   : > { %s214_s10 = scalar_lea.vmem %s892_s3, %s450_s23 }
 0x1c8   : > { %v303_v18 = vpop.xlane.xlu0 %302 }
 0x1cc   : > { %v308_v19 = vpop.xlane.xlu0 %307 }
 0x1cd   : > { %v310_v20 = vsel %vm309_vm2, %v303_v18, %v308_v19 }
 0x1ce   : > { %312 = vst.msk [vmem:[%s214_s10] sm:$0xff] %vm311_vm3, %v310_v20 }
 0x1cf PF: > { %s347_s24 = sand.u32 1, %s653_s12   ;;  %p912_p0 = scmp.ne.s32.totalorder %s901_s25, 0 }
 0x1d0   : > { %p913_p10 = scmp.ge.s32.totalorder %s665_s15, 2  ;;  %s348_s4 = scalar_lea.sflag [#allocation4], %s347_s24 }
 0x1d2   : > { %p485_p6 = pnand %p913_p10, %p912_p0 }
 0x1d4   : > { %648 = dma.done.wait (!%p485_p6), %s348_s4, 256  }
 0x1d5   : > { %650 = vsyncadd (!%p485_p6), %s348_s4, 4294967040  ;;  %p18_p13 = scmp.ge.s32.totalorder %s719_s18, 4   ;;  %s914_s12 = smov %s657_s13 }
 0x1d6   : > { %s915_s13 = smov %s661_s14  ;;  %s916_s14 = smov %s731_s21 }
 0x1d7   : > { %s917_s15 = smov %s719_s18  ;;  %20 = sbr.rel (!%p18_p13) target bundleno = 6 (0x6), region = 90 }
 0x1de   :  { %360 = vsyncpa [#allocation3], 1 }
 0x1df   :  { %362 = vsyncpa [#allocation3 + $0x1], 1 }
 0x1e0   :  { %363 = vsyncpa [#allocation6], 1 }
 0x1e1   :  { %365 = vsyncpa [#allocation6 + $0x1], 1 }
 0x1e2   :  { %366 = vsyncpa [#allocation4], 1 }
 0x1e3   :  { %368 = vsyncpa [#allocation4 + $0x1], 1 }

</bundles_post_ra>
